<compile_context>
chip_gen: v7x
topology: tpu7x:2x2x1
jax: 0.10.0
libtpu: 0.0.40
codegen_flags: <defaults>
</compile_context>

<pallas_src>
import jax
import jax.numpy as jnp
from jax.experimental import pallas as pl
from jax.experimental.pallas import tpu as pltpu


def conv_bn_relu_kernel(a_ref, w_ref, shift_ref, o_ref):
    # a_ref:     (TM2, 2K)   two consecutive im2col rows packed per row (bf16)
    # w_ref:     (2K, 128)   block-diagonal, BN-scale-folded weights (bf16)
    # shift_ref: (1, 128)    folded conv-bias + BN shift, tiled x2 (f32)
    # o_ref:     (TM2, 128)  two consecutive output rows per row (lane-dense)
    acc = jnp.dot(a_ref[...], w_ref[...], preferred_element_type=jnp.float32)
    o_ref[...] = jnp.maximum(acc + shift_ref[...], 0.0).astype(o_ref.dtype)


def _im2col(x_nhwc):
    # (N, H, W, Cin) -> (N*H*W, 9*Cin) with K ordered as (kh, kw, cin).
    N, H, W, Cin = x_nhwc.shape
    xp = jnp.pad(x_nhwc, ((0, 0), (1, 1), (1, 1), (0, 0)))   # padding=1
    cols = [xp[:, kh:kh + H, kw:kw + W, :]
            for kh in range(3) for kw in range(3)]
    patches = jnp.concatenate(cols, axis=-1)                  # (N, H, W, 9*Cin)
    return patches.reshape(N * H * W, 9 * Cin)


def conv_bn_relu(x_nchw, w_oihw, bias, gamma, beta, running_mean, running_var,
                 eps=1e-5, tm=4096):
    N, Cin, H, W = x_nchw.shape
    Cout = w_oihw.shape[0]
    K = 9 * Cin

    # --- wrapper glue (plain XLA): im2col + BN fold + lane-dense packing ---
    x_nhwc = jnp.transpose(x_nchw, (0, 2, 3, 1))              # NCHW -> NHWC
    a = _im2col(x_nhwc).astype(jnp.float32)                   # (M, K)
    M = a.shape[0]

    # Eval-mode BN folding: scale goes into the weights, shift stays additive.
    inv_std = 1.0 / jnp.sqrt(running_var + eps)
    scale = (gamma * inv_std).astype(jnp.float32)                       # (Cout,)
    shift = ((bias - running_mean) * scale + beta).astype(jnp.float32)  # (Cout,)
    # OIHW -> (kh, kw, cin, cout) -> (K, Cout); matches the patch K-ordering.
    w_mat = jnp.transpose(w_oihw, (2, 3, 1, 0)).reshape(K, Cout)
    w_mat = (w_mat.astype(jnp.float32) * scale[None, :])                # (K, Cout)

    # Lane-dense packing: two consecutive output rows share one 128-lane row.
    if M % 2:
        a = jnp.pad(a, ((0, 1), (0, 0)))
    M_even = a.shape[0]
    M2 = M_even // 2
    a2 = a.reshape(M2, 2 * K)                   # row i = [A[2i, :], A[2i+1, :]]
    zeros = jnp.zeros_like(w_mat)
    w2 = jnp.concatenate(
        [jnp.concatenate([w_mat, zeros], axis=1),
         jnp.concatenate([zeros, w_mat], axis=1)], axis=0)    # (2K, 2*Cout)
    shift2 = jnp.tile(shift, 2).reshape(1, 2 * Cout)          # (1, 128)

    # bf16 operands halve the dominant (9x-blown-up) DMA stream; acc stays f32.
    a2 = a2.astype(jnp.bfloat16)
    w2 = w2.astype(jnp.bfloat16)

    # --- tile the packed-row axis; a single grid step at small sizes ---
    tm2 = min(tm, M2)            # tm default is 8/16-aligned; tm2==M2 => full dim
    n_tiles = pl.cdiv(M2, tm2)
    m2_pad = n_tiles * tm2
    if m2_pad != M2:
        a2 = jnp.pad(a2, ((0, m2_pad - M2), (0, 0)))

    out2 = pl.pallas_call(
        conv_bn_relu_kernel,
        out_shape=jax.ShapeDtypeStruct((m2_pad, 2 * Cout), x_nchw.dtype),
        grid=(n_tiles,),
        in_specs=[
            pl.BlockSpec((tm2, 2 * K), lambda i: (i, 0)),
            pl.BlockSpec((2 * K, 2 * Cout), lambda i: (0, 0)),
            pl.BlockSpec((1, 2 * Cout), lambda i: (0, 0)),
        ],
        out_specs=pl.BlockSpec((tm2, 2 * Cout), lambda i: (i, 0)),
        compiler_params=pltpu.CompilerParams(
            # Single grid step at these sizes; for very large M on v7x, switch
            # this axis to pltpu.CORE_PARALLEL to shard tiles across the 2 TCs.
            dimension_semantics=("arbitrary",)),
    )(a2, w2, shift2)

    # (m2_pad, 128) -> (M, 64): same row-major bytes, just unpack + trim pads.
    out = out2[:M2].reshape(M_even, Cout)[:M].reshape(N, H, W, Cout)
    return jnp.transpose(out, (0, 3, 1, 2))                   # NHWC -> NCHW


def _reference(x_nchw, w_oihw, bias, gamma, beta, running_mean, running_var,
               eps=1e-5):
    conv = jax.lax.conv_general_dilated(
        x_nchw, w_oihw, window_strides=(1, 1), padding=((1, 1), (1, 1)),
        dimension_numbers=("NCHW", "OIHW", "NCHW"))
    conv = conv + bias[None, :, None, None]
    inv_std = 1.0 / jnp.sqrt(running_var + eps)
    y = (conv - running_mean[None, :, None, None]) \
        * (gamma * inv_std)[None, :, None, None]
    y = y + beta[None, :, None, None]
    return jnp.maximum(y, 0.0)


if __name__ == "__main__":
    key = jax.random.PRNGKey(0)
    k_x, k_w, k_b, k_g, k_be, k_m, k_v = jax.random.split(key, 7)

    N, Cin, H, W, Cout = 2, 3, 16, 16, 64

    x = jax.random.normal(k_x, (N, Cin, H, W), dtype=jnp.float32)

    # Shapes from nn.Conv2d(3, 64, 3, padding=1) / nn.BatchNorm2d(64).
    w = 0.1 * jax.random.normal(k_w, (Cout, Cin, 3, 3), dtype=jnp.float32)
    bias = 0.05 * jax.random.normal(k_b, (Cout,), dtype=jnp.float32)
    gamma = 1.0 + 0.1 * jax.random.normal(k_g, (Cout,), dtype=jnp.float32)
    beta = 0.1 * jax.random.normal(k_be, (Cout,), dtype=jnp.float32)
    running_mean = 0.1 * jax.random.normal(k_m, (Cout,), dtype=jnp.float32)
    running_var = jnp.abs(1.0 + 0.1 * jax.random.normal(k_v, (Cout,),
                                                        dtype=jnp.float32))

    out = conv_bn_relu(x, w, bias, gamma, beta, running_mean, running_var)
    out = jax.block_until_ready(out)

    ref = _reference(x, w, bias, gamma, beta, running_mean, running_var)
    assert out.shape == (N, Cout, H, W)
    # bf16 operands with f32 accumulation -> loosened tolerance.
    assert jnp.allclose(out, ref, rtol=2e-2, atol=2e-2), "mismatch vs reference"

    print("KERNEL_OK")
</pallas_src>

<mosaic_0001>
module attributes {stable_mosaic.version = 11 : i64} {
  func.func @conv_bn_relu_kernel(%arg0: i32, %arg1: memref<256x54xbf16, #tpu.memory_space<vmem>>, %arg2: memref<54x128xbf16, #tpu.memory_space<vmem>>, %arg3: memref<1x128xf32, #tpu.memory_space<vmem>>, %arg4: memref<256x128xf32, #tpu.memory_space<vmem>>) attributes {dimension_semantics = [#tpu.dimension_semantics<arbitrary>], iteration_bounds = array<i64: 1>, scalar_prefetch = 0 : i64, scratch_operands = 0 : i64, tpu.core_type = #tpu.core_type<tc>, window_params = [{transform_indices = @transform_0, window_bounds = array<i64: 256, 54>}, {pipeline_mode = #tpu.pipeline_mode<synchronous>, transform_indices = @transform_1, window_bounds = array<i64: 54, 128>}, {pipeline_mode = #tpu.pipeline_mode<synchronous>, transform_indices = @transform_2, window_bounds = array<i64: 1, 128>}, {transform_indices = @transform_3, window_bounds = array<i64: 256, 128>}]} {
    %c0 = arith.constant 0 : index
    %c0_0 = arith.constant 0 : index
    %0 = vector.load %arg1[%c0, %c0_0] : memref<256x54xbf16, #tpu.memory_space<vmem>>, vector<256x54xbf16>
    %c0_1 = arith.constant 0 : index
    %c0_2 = arith.constant 0 : index
    %1 = vector.load %arg2[%c0_1, %c0_2] : memref<54x128xbf16, #tpu.memory_space<vmem>>, vector<54x128xbf16>
    %cst = arith.constant dense<0.000000e+00> : vector<256x128xf32>
    %2 = tpu.matmul %0, %1, %cst {dimension_numbers = #tpu.dot_dimension_numbers<[1], [0], [0], [1], [0, 0, 1, 1], [], []>} : vector<256x54xbf16>, vector<54x128xbf16>, vector<256x128xf32> -> vector<256x128xf32>
    %c0_3 = arith.constant 0 : index
    %c0_4 = arith.constant 0 : index
    %3 = vector.load %arg3[%c0_3, %c0_4] : memref<1x128xf32, #tpu.memory_space<vmem>>, vector<1x128xf32>
    %4 = vector.broadcast %3 : vector<1x128xf32> to vector<256x128xf32>
    %5 = arith.addf %2, %4 : vector<256x128xf32>
    %cst_5 = arith.constant 0.000000e+00 : f32
    %6 = vector.broadcast %cst_5 : f32 to vector<256x128xf32>
    %7 = arith.maximumf %5, %6 : vector<256x128xf32>
    %c0_6 = arith.constant 0 : index
    %c0_7 = arith.constant 0 : index
    %8 = vector.load %arg4[%c0_6, %c0_7] : memref<256x128xf32, #tpu.memory_space<vmem>>, vector<256x128xf32>
    tpu.vector_store %arg4[%c0_6, %c0_7], %7 {strides = array<i32>} : memref<256x128xf32, #tpu.memory_space<vmem>>, vector<256x128xf32>,
    return
  }
  func.func @transform_0(%arg0: i32) -> (i32, i32) {
    %c0_i32 = arith.constant 0 : i32
    %c0_i32_0 = arith.constant 0 : i32
    return %arg0, %c0_i32 : i32, i32
  }
  func.func @transform_1(%arg0: i32) -> (i32, i32) {
    %c0_i32 = arith.constant 0 : i32
    %c0_i32_0 = arith.constant 0 : i32
    %c0_i32_1 = arith.constant 0 : i32
    return %c0_i32, %c0_i32_0 : i32, i32
  }
  func.func @transform_2(%arg0: i32) -> (i32, i32) {
    %c0_i32 = arith.constant 0 : i32
    %c0_i32_0 = arith.constant 0 : i32
    %c0_i32_1 = arith.constant 0 : i32
    return %c0_i32, %c0_i32_0 : i32, i32
  }
  func.func @transform_3(%arg0: i32) -> (i32, i32) {
    %c0_i32 = arith.constant 0 : i32
    %c0_i32_0 = arith.constant 0 : i32
    return %arg0, %c0_i32 : i32, i32
  }
}

</mosaic_0001>

<bundles_post_ra>
// kernel: tpu_custom_call.1
= control target key start
LH: loop header
LB: loop body
LE: loop exit
PB: predicated region body
PF: predicated region fallthrough
CT: control target
= control target key end

     0   :  { %vm163_vm0 = vcmask 441344   ;;  %vm212_vm1 = vcmask 1042432   ;;  %s759_s0 = inlined_call_operand.vmem [shape: bf16[256,54], index: 0, kind: input, shape index: {}]   ;;  %s760_s1 = inlined_call_operand.vmem [shape: bf16[54,128], index: 1, kind: input, shape index: {}]   ;;  %s761_s2 = inlined_call_operand.vmem [shape: f32[1,128], index: 2, kind: input, shape index: {}]   ;;  %s762_s3 = inlined_call_operand.hbm [shape: f32[256,128], index: 3, kind: output, shape index: {}]  }
   0x1   :  { %v567_v0 = vld [vmem:[%s760_s1] sm:$0xff]   ;;  %v568_v1 = vld [vmem:[%s760_s1 + $0x8] sm:$0xff]   ;;  %v569_v2 = vld [vmem:[%s760_s1 + $0x10] sm:$0xff]  }
   0x2   :  { %514 = vmatprep.subr.bf16.mxu0 %v567_v0  ;;  %554 = vmatprep.subr.bf16.mxu1 %v567_v0  ;;  %v571_v3 = vld [vmem:[%s759_s0] sm:$0xff]   ;;  %v570_v5 = vld [vmem:[%s760_s1 + $0x18] ss:$0 sps:$4 sm:$0x77]   ;;  %v573_v7 = vld [vmem:[%s759_s0 + $0x8] sm:$0xff]  }
   0x3   :  { %515 = vmatpush3.bf16.msra.mxu0 %v567_v0  ;;  %558 = vmatpush3.bf16.msra.mxu1 %v567_v0  ;;  %v572_v4 = vld [vmem:[%s759_s0 + $0x40] sm:$0xff]   ;;  %v214_v6 = vsel %vm212_vm1, %v570_v5, 0  ;;  %v574_v8 = vld [vmem:[%s759_s0 + $0x48] sm:$0xff]   ;;  %v575_v9 = vld [vmem:[%s759_s0 + $0x10] sm:$0xff]  }
   0x4   :  { %516 = vmatprep.subr.bf16.mxu0 %v568_v1  ;;  %555 = vmatprep.subr.bf16.mxu1 %v568_v1  ;;  %v576_v10 = vld [vmem:[%s759_s0 + $0x50] sm:$0xff]  }
   0x5   :  { %522 = vmatprep.mubr.msk.bf16.mxu0 %vm163_vm0, %v571_v3  ;;  %538 = vmatprep.mubr.msk.bf16.mxu1 %vm163_vm0, %v572_v4 }
   0x7   :  { %517 = vmatpush3.bf16.msra.mxu0 %v568_v1  ;;  %559 = vmatpush3.bf16.msra.mxu1 %v568_v1 }
   0x8   :  { %518 = vmatprep.subr.bf16.mxu0 %v569_v2  ;;  %556 = vmatprep.subr.bf16.mxu1 %v569_v2 }
   0xb   :  { %519 = vmatpush3.bf16.msra.mxu0 %v569_v2  ;;  %560 = vmatpush3.bf16.msra.mxu1 %v569_v2 }
   0xc   :  { %562 = vmatprep.subr.msk.bf16.mxu0 %vm212_vm1, %v570_v5  ;;  %563 = vmatprep.subr.msk.bf16.mxu1 %vm212_vm1, %v570_v5 }
   0xf   :  { %521 = vmatpush3.bf16.msra.mxu0 %v214_v6  ;;  %561 = vmatpush3.bf16.msra.mxu1 %v214_v6 }
  0x12   :  { %523 = vmatmul.mubr.msk.bf16.vlgmr.msra.gmra.mrb[0].mxu0 %vm163_vm0, %v573_v7  ;;  %539 = vmatmul.mubr.msk.bf16.vlgmr.msra.gmra.mrb[0].mxu1 %vm163_vm0, %v574_v8 }
  0x13   :  { %526 = vmatprep.mubr.msk.bf16.mxu0 %vm163_vm0, %v575_v9  ;;  %542 = vmatprep.mubr.msk.bf16.mxu1 %vm163_vm0, %v576_v10 }
  0x14   :  { %8 = vsyncpa [#allocation3], 0  ;;  %v577_v11 = vld [vmem:[%s759_s0 + $0x18] sm:$0xff]   ;;  %v579_v13 = vld [vmem:[%s759_s0 + $0x20] sm:$0xff]  }
  0x15   :  { %v578_v12 = vld [vmem:[%s759_s0 + $0x58] sm:$0xff]   ;;  %v580_v14 = vld [vmem:[%s759_s0 + $0x60] sm:$0xff]   ;;  %v581_v15 = vld [vmem:[%s759_s0 + $0x28] sm:$0xff]  }
  0x16   :  { %v582_v16 = vld [vmem:[%s759_s0 + $0x68] sm:$0xff]   ;;  %v583_v17 = vld [vmem:[%s759_s0 + $0x30] sm:$0xff]   ;;  %v585_v19 = vld [vmem:[%s759_s0 + $0x38] sm:$0xff]  }
  0x17   :  { %v584_v18 = vld [vmem:[%s759_s0 + $0x70] sm:$0xff]   ;;  %v586_v20 = vld [vmem:[%s759_s0 + $0x78] sm:$0xff]   ;;  %v713_v21 = vld [vmem:[%s761_s2] ss:$0 sm:$0xff]  ;;  %s611_s0 = smov [#allocation2]  }
  0x18   :  { %s446_s2 = sshll.u32 %s611_s0, 4  ;;  %s447_s2 = int_to_ptr.vmem [resolvable:$true] %s446_s2 }
  0x19   :  { %s587_s26 = scalar_lea.vmem %s447_s2, 4096  ;;  %p592_p1 = scmp.lt.s32.totalorder %s447_s2, %s447_s2 }
  0x1a   :  { %527 = vmatmul.mubr.msk.bf16.gmra.mrb[4].mxu0 %vm163_vm0, %v577_v11  ;;  %543 = vmatmul.mubr.msk.bf16.gmra.mrb[4].mxu1 %vm163_vm0, %v578_v12  ;;  %p588_p0 = scmp.ne.s32.totalorder %s447_s2, %s587_s26  ;;  %p593_p2 = scmp.lt.s32.totalorder %s587_s26, %s587_s26 }
  0x1b   :  { %530 = vmatprep.mubr.msk.bf16.mxu0 %vm163_vm0, %v579_v13  ;;  %546 = vmatprep.mubr.msk.bf16.mxu1 %vm163_vm0, %v580_v14 }
  0x1c   :  { %p594_p3 = por %p593_p2, %p592_p1 }
  0x1e   :  { %p595_p4 = pnand %p594_p3, %p588_p0 }
  0x22   :  { %531 = vmatmul.mubr.msk.bf16.gmra.mrb[8].mxu0 %vm163_vm0, %v581_v15  ;;  %547 = vmatmul.mubr.msk.bf16.gmra.mrb[8].mxu1 %vm163_vm0, %v582_v16 }
  0x23   :  { %534 = vmatprep.mubr.msk.bf16.mxu0 %vm163_vm0, %v583_v17  ;;  %550 = vmatprep.mubr.msk.bf16.mxu1 %vm163_vm0, %v584_v18 }
  0x2a   :  { %535 = vmatmul.mubr.msk.bf16.gmra.mrb[12].mxu0 %vm163_vm0, %v585_v19  ;;  %551 = vmatmul.mubr.msk.bf16.gmra.mrb[12].mxu1 %vm163_vm0, %v586_v20 }
  0xe5   :  { %v524_v22 = vpop.f32.mrb[0].mxu0  ;;  %v540_v23 = vpop.f32.mrb[0].mxu1 }
  0xe6   :  { %v259_v24 = vadd.f32 %v524_v22, %v713_v21  ;;  %v323_v25 = vadd.f32 %v540_v23, %v713_v21  ;;  %v250_v26 = vpop.f32.mrb[1].mxu0  ;;  %v314_v27 = vpop.f32.mrb[1].mxu1 }
  0xe7   :  { %v251_v28 = vadd.f32 %v713_v21, %v250_v26  ;;  %v315_v29 = vadd.f32 %v713_v21, %v314_v27  ;;  %v525_v30 = vpop.f32.mrb[2].mxu0  ;;  %v541_v31 = vpop.f32.mrb[2].mxu1 }
  0xe8   :  { %v379_v32 = vmax.f32 %v259_v24, 0.0  ;;  %v395_v33 = vmax.f32 %v323_v25, 0.0  ;;  %v262_v34 = vadd.f32 %v525_v30, %v713_v21  ;;  %v326_v35 = vadd.f32 %v541_v31, %v713_v21  ;;  %v253_v36 = vpop.f32.mrb[3].mxu0  ;;  %v317_v37 = vpop.f32.mrb[3].mxu1 }
  0xe9   :  { %v377_v38 = vmax.f32 %v251_v28, 0.0  ;;  %v393_v39 = vmax.f32 %v315_v29, 0.0  ;;  %v254_v40 = vadd.f32 %v713_v21, %v253_v36  ;;  %v318_v41 = vadd.f32 %v713_v21, %v317_v37 }
  0xea   :  { %411 = vst [vmem:[#allocation2 + $0x10] sm:$0xff] %v379_v32  ;;  %427 = vst [vmem:[#allocation2 + $0x90] sm:$0xff] %v395_v33  ;;  %v380_v42 = vmax.f32 %v262_v34, 0.0  ;;  %v396_v43 = vmax.f32 %v326_v35, 0.0 }
  0xeb   :  { %409 = vst [vmem:[#allocation2] sm:$0xff] %v377_v38  ;;  %425 = vst [vmem:[#allocation2 + $0x80] sm:$0xff] %v393_v39  ;;  %v378_v44 = vmax.f32 %v254_v40, 0.0  ;;  %v394_v45 = vmax.f32 %v318_v41, 0.0 }
  0xec   :  { %412 = vst [vmem:[#allocation2 + $0x18] sm:$0xff] %v380_v42  ;;  %428 = vst [vmem:[#allocation2 + $0x98] sm:$0xff] %v396_v43 }
  0xed   :  { %410 = vst [vmem:[#allocation2 + $0x8] sm:$0xff] %v378_v44  ;;  %426 = vst [vmem:[#allocation2 + $0x88] sm:$0xff] %v394_v45  ;;  %v528_v46 = vpop.f32.mrb[4].mxu0  ;;  %v544_v47 = vpop.f32.mrb[4].mxu1 }
  0xee   :  { %v275_v48 = vadd.f32 %v528_v46, %v713_v21  ;;  %v339_v49 = vadd.f32 %v544_v47, %v713_v21  ;;  %v266_v50 = vpop.f32.mrb[5].mxu0  ;;  %v330_v51 = vpop.f32.mrb[5].mxu1 }
  0xef   :  { %v267_v52 = vadd.f32 %v713_v21, %v266_v50  ;;  %v331_v53 = vadd.f32 %v713_v21, %v330_v51  ;;  %v529_v54 = vpop.f32.mrb[6].mxu0  ;;  %v545_v55 = vpop.f32.mrb[6].mxu1 }
  0xf0   :  { %v383_v56 = vmax.f32 %v275_v48, 0.0  ;;  %v399_v57 = vmax.f32 %v339_v49, 0.0  ;;  %v278_v58 = vadd.f32 %v529_v54, %v713_v21  ;;  %v342_v59 = vadd.f32 %v545_v55, %v713_v21  ;;  %v269_v60 = vpop.f32.mrb[7].mxu0  ;;  %v333_v61 = vpop.f32.mrb[7].mxu1 }
  0xf1   :  { %v381_v62 = vmax.f32 %v267_v52, 0.0  ;;  %v397_v63 = vmax.f32 %v331_v53, 0.0  ;;  %v270_v0 = vadd.f32 %v713_v21, %v269_v60  ;;  %v334_v1 = vadd.f32 %v713_v21, %v333_v61 }
  0xf2   :  { %415 = vst [vmem:[#allocation2 + $0x30] sm:$0xff] %v383_v56  ;;  %431 = vst [vmem:[#allocation2 + $0xb0] sm:$0xff] %v399_v57  ;;  %v384_v2 = vmax.f32 %v278_v58, 0.0  ;;  %v400_v3 = vmax.f32 %v342_v59, 0.0 }
  0xf3   :  { %413 = vst [vmem:[#allocation2 + $0x20] sm:$0xff] %v381_v62  ;;  %429 = vst [vmem:[#allocation2 + $0xa0] sm:$0xff] %v397_v63  ;;  %v382_v4 = vmax.f32 %v270_v0, 0.0  ;;  %v398_v5 = vmax.f32 %v334_v1, 0.0 }
  0xf4   :  { %416 = vst [vmem:[#allocation2 + $0x38] sm:$0xff] %v384_v2  ;;  %432 = vst [vmem:[#allocation2 + $0xb8] sm:$0xff] %v400_v3 }
  0xf5   :  { %414 = vst [vmem:[#allocation2 + $0x28] sm:$0xff] %v382_v4  ;;  %430 = vst [vmem:[#allocation2 + $0xa8] sm:$0xff] %v398_v5  ;;  %v532_v6 = vpop.f32.mrb[8].mxu0  ;;  %v548_v7 = vpop.f32.mrb[8].mxu1 }
  0xf6   :  { %v291_v8 = vadd.f32 %v532_v6, %v713_v21  ;;  %v355_v9 = vadd.f32 %v548_v7, %v713_v21  ;;  %v282_v10 = vpop.f32.mrb[9].mxu0  ;;  %v346_v11 = vpop.f32.mrb[9].mxu1 }
  0xf7   :  { %v283_v12 = vadd.f32 %v713_v21, %v282_v10  ;;  %v347_v13 = vadd.f32 %v713_v21, %v346_v11  ;;  %v533_v14 = vpop.f32.mrb[10].mxu0  ;;  %v549_v15 = vpop.f32.mrb[10].mxu1 }
  0xf8   :  { %v387_v16 = vmax.f32 %v291_v8, 0.0  ;;  %v403_v17 = vmax.f32 %v355_v9, 0.0  ;;  %v294_v18 = vadd.f32 %v533_v14, %v713_v21  ;;  %v358_v19 = vadd.f32 %v549_v15, %v713_v21  ;;  %v285_v20 = vpop.f32.mrb[11].mxu0  ;;  %v349_v22 = vpop.f32.mrb[11].mxu1 }
  0xf9   :  { %v385_v23 = vmax.f32 %v283_v12, 0.0  ;;  %v401_v24 = vmax.f32 %v347_v13, 0.0  ;;  %v286_v25 = vadd.f32 %v713_v21, %v285_v20  ;;  %v350_v26 = vadd.f32 %v713_v21, %v349_v22 }
  0xfa   :  { %419 = vst [vmem:[#allocation2 + $0x50] sm:$0xff] %v387_v16  ;;  %435 = vst [vmem:[#allocation2 + $0xd0] sm:$0xff] %v403_v17  ;;  %v388_v27 = vmax.f32 %v294_v18, 0.0  ;;  %v404_v28 = vmax.f32 %v358_v19, 0.0 }
  0xfb   :  { %417 = vst [vmem:[#allocation2 + $0x40] sm:$0xff] %v385_v23  ;;  %433 = vst [vmem:[#allocation2 + $0xc0] sm:$0xff] %v401_v24  ;;  %v386_v29 = vmax.f32 %v286_v25, 0.0  ;;  %v402_v30 = vmax.f32 %v350_v26, 0.0 }
  0xfc   :  { %420 = vst [vmem:[#allocation2 + $0x58] sm:$0xff] %v388_v27  ;;  %436 = vst [vmem:[#allocation2 + $0xd8] sm:$0xff] %v404_v28 }
  0xfd   :  { %418 = vst [vmem:[#allocation2 + $0x48] sm:$0xff] %v386_v29  ;;  %434 = vst [vmem:[#allocation2 + $0xc8] sm:$0xff] %v402_v30  ;;  %v536_v31 = vpop.f32.mrb[12].mxu0  ;;  %v552_v32 = vpop.f32.mrb[12].mxu1 }
  0xfe   :  { %v307_v33 = vadd.f32 %v536_v31, %v713_v21  ;;  %v371_v34 = vadd.f32 %v552_v32, %v713_v21  ;;  %v298_v35 = vpop.f32.mrb[13].mxu0  ;;  %v362_v36 = vpop.f32.mrb[13].mxu1 }
  0xff   :  { %v299_v37 = vadd.f32 %v713_v21, %v298_v35  ;;  %v363_v38 = vadd.f32 %v713_v21, %v362_v36  ;;  %v537_v39 = vpop.f32.mrb[14].mxu0  ;;  %v553_v40 = vpop.f32.mrb[14].mxu1 }
 0x100   :  { %v391_v41 = vmax.f32 %v307_v33, 0.0  ;;  %v407_v42 = vmax.f32 %v371_v34, 0.0  ;;  %v310_v43 = vadd.f32 %v537_v39, %v713_v21  ;;  %v374_v44 = vadd.f32 %v553_v40, %v713_v21  ;;  %v301_v45 = vpop.f32.mrb[15].mxu0  ;;  %v365_v46 = vpop.f32.mrb[15].mxu1 }
 0x101   :  { %v389_v47 = vmax.f32 %v299_v37, 0.0  ;;  %v405_v48 = vmax.f32 %v363_v38, 0.0  ;;  %v302_v49 = vadd.f32 %v713_v21, %v301_v45  ;;  %v366_v50 = vadd.f32 %v713_v21, %v365_v46 }
 0x102   :  { %423 = vst [vmem:[#allocation2 + $0x70] sm:$0xff] %v391_v41  ;;  %439 = vst [vmem:[#allocation2 + $0xf0] sm:$0xff] %v407_v42  ;;  %v392_v51 = vmax.f32 %v310_v43, 0.0  ;;  %v408_v52 = vmax.f32 %v374_v44, 0.0 }
 0x103   :  { %421 = vst [vmem:[#allocation2 + $0x60] sm:$0xff] %v389_v47  ;;  %437 = vst [vmem:[#allocation2 + $0xe0] sm:$0xff] %v405_v48  ;;  %v390_v53 = vmax.f32 %v302_v49, 0.0  ;;  %v406_v54 = vmax.f32 %v366_v50, 0.0 }
 0x104   :  { %424 = vst [vmem:[#allocation2 + $0x78] sm:$0xff] %v392_v51  ;;  %440 = vst [vmem:[#allocation2 + $0xf8] sm:$0xff] %v408_v52 }
 0x105   :  { %422 = vst [vmem:[#allocation2 + $0x68] sm:$0xff] %v390_v53  ;;  %438 = vst [vmem:[#allocation2 + $0xe8] sm:$0xff] %v406_v54 }
 0x106   :  { %598 = shalt.err (!%p595_p4)
}
 0x107   :  { %s599_s28 = scalar_lea.hbm %s762_s3, 4096 }
 0x108   :  { %p600_p5 = scmp.ne.s32.totalorder %s762_s3, %s599_s28  ;;  %p603_p6 = scmp.lt.u32.totalorder %s599_s28, %s762_s3 }
 0x10a   :  { %p605_p7 = pnand %p603_p6, %p600_p5 }
 0x10c   :  { %608 = shalt.err (!%p605_p7)
}
 0x10d   :  { %s612_s6 = smov 128   ;;  %s613_s7 = smov 8  }
 0x10e   :  { %452 = dma.vmem_to_hbm [thread:$0]  %s447_s2, 4096, %s762_s3, [#allocation3], %s612_s6, %s612_s6, %s613_s7  }
 0x10f   :  { %609 = dma.done.wait [#allocation3], 4096  }
 0x110   :  { %610 = vsyncadd [#allocation3], 4294963200 }
 0x111   :  { %456 = vsyncpa [#allocation3], 1 }

</bundles_post_ra>
